<compile_context>
chip_gen: v6e
topology: v6e:2x2x1
jax: 0.10.0
libtpu: 0.0.40
codegen_flags: <defaults>
</compile_context>

<pallas_src>
import functools

import jax
import jax.numpy as jnp
from jax.experimental import pallas as pl
from jax.experimental.pallas import tpu as pltpu


def _custom_clip_kernel(x_ref, w1t_ref, w2t_ref, o_ref, *, ratio):
    """One batch tile: relu(relu(x @ W1t) @ W2t), residual mix with x, L2-normalize rows."""
    x_lo = x_ref[...]                                                      # (TB, D) compute dtype

    # Adapter: Linear(D -> D//4) -> ReLU -> Linear(D//4 -> D) -> ReLU (no bias).
    # MXU matmuls with low-precision operands, f32 accumulation.
    h = jnp.dot(x_lo, w1t_ref[...], preferred_element_type=jnp.float32)   # (TB, D//4) f32
    h = jnp.maximum(h, 0.0)
    y = jnp.dot(h.astype(w2t_ref.dtype), w2t_ref[...],
                preferred_element_type=jnp.float32)                       # (TB, D) f32
    y = jnp.maximum(y, 0.0)

    # Residual mix + L2 normalization in f32 (VPU / EUP path).
    x = x_lo.astype(jnp.float32)
    f = ratio * y + (1.0 - ratio) * x                                      # (TB, D)
    sq = jnp.sum(f * f, axis=-1, keepdims=True)                            # (TB, 1)
    inv_norm = jax.lax.rsqrt(sq + 1e-12)                                   # eps guard, EUP slot is free
    o_ref[...] = (f * inv_norm).astype(o_ref.dtype)


def _choose_tile_b(batch, row_align, max_tile=256):
    """Pick a batch tile: multiple of `row_align`, <= max_tile, and prefer >= 2 grid steps."""
    b_pad = max(row_align, pl.cdiv(batch, row_align) * row_align)
    tile = min(max_tile, b_pad)
    if b_pad // tile < 2 and b_pad >= 2 * row_align:
        # Split into at least two tiles so a multi-TensorCore chip (v7x) can shard the grid.
        half = pl.cdiv(b_pad, 2)
        tile = min(max_tile, pl.cdiv(half, row_align) * row_align)
    return max(tile, row_align)


def custom_clip_forward(image_features, w1, w2, ratio, *, tile_b=None,
                        compute_dtype=jnp.bfloat16, out_dtype=jnp.float32):
    """image_features: (B, D).
    w1: PyTorch Linear weight (D//4, D); w2: PyTorch Linear weight (D, D//4). Returns (B, D)."""
    B, D = image_features.shape
    D4 = w1.shape[0]
    assert w1.shape == (D4, D) and w2.shape == (D, D4)

    # Sublane packing: bf16 packs 16 rows per vreg tile, f32 packs 8.
    row_align = 16 if compute_dtype == jnp.bfloat16 else 8
    if tile_b is None:
        tile_b = _choose_tile_b(B, row_align)
    assert tile_b % row_align == 0

    # Pad the batch so it divides evenly into tiles; padded rows are zero and sliced off.
    B_pad = pl.cdiv(B, tile_b) * tile_b
    x = jnp.asarray(image_features).astype(compute_dtype)
    if B_pad != B:
        x = jnp.pad(x, ((0, B_pad - B), (0, 0)))

    # Pre-transpose weights to (in, out) so the kernel does x @ W directly.
    w1t = jnp.asarray(w1).astype(compute_dtype).T       # (D, D4)
    w2t = jnp.asarray(w2).astype(compute_dtype).T       # (D4, D)

    kernel = functools.partial(_custom_clip_kernel, ratio=float(ratio))

    out = pl.pallas_call(
        kernel,
        out_shape=jax.ShapeDtypeStruct((B_pad, D), out_dtype),
        grid_spec=pltpu.PrefetchScalarGridSpec(
            num_scalar_prefetch=0,
            grid=(B_pad // tile_b,),
            in_specs=[
                pl.BlockSpec((tile_b, D), lambda i: (i, 0)),   # feature tile
                pl.BlockSpec((D, D4), lambda i: (0, 0)),       # W1^T, VMEM-resident (constant index)
                pl.BlockSpec((D4, D), lambda i: (0, 0)),       # W2^T, VMEM-resident (constant index)
            ],
            out_specs=pl.BlockSpec((tile_b, D), lambda i: (i, 0)),
        ),
        compiler_params=pltpu.CompilerParams(
            dimension_semantics=("parallel",),                 # shard batch tiles across TCs
        ),
    )(x, w1t, w2t)

    return out[:B] if B_pad != B else out


def custom_clip_reference(image_features, w1, w2, ratio):
    x = image_features.astype(jnp.float32)
    h = jnp.maximum(x @ w1.T, 0.0)
    y = jnp.maximum(h @ w2.T, 0.0)
    f = ratio * y + (1.0 - ratio) * x
    return f / jnp.linalg.norm(f, axis=-1, keepdims=True)


if __name__ == "__main__":
    # Small, TPU-friendly shapes consistent with the module:
    #   clip_out = 512 (CLIP feature dim), reduction = 4 -> hidden = 128, batch = 32.
    B, CLIP_OUT, REDUCTION, RATIO = 32, 512, 4, 0.2
    D4 = CLIP_OUT // REDUCTION

    key = jax.random.PRNGKey(0)
    k_feat, k_w1, k_w2 = jax.random.split(key, 3)

    # Stand-in for model_clip.encode_image(x): deterministic synthetic features.
    image_features = jax.random.normal(k_feat, (B, CLIP_OUT), dtype=jnp.float32)

    # Adapter weights, PyTorch nn.Linear layout (out_features, in_features), no bias.
    w1 = jax.random.normal(k_w1, (D4, CLIP_OUT), dtype=jnp.float32) * (1.0 / CLIP_OUT ** 0.5)
    w2 = jax.random.normal(k_w2, (CLIP_OUT, D4), dtype=jnp.float32) * (1.0 / D4 ** 0.5)

    ref = custom_clip_reference(image_features, w1, w2, RATIO)

    # Default fast path: bf16 MXU operands, f32 accumulate/normalize (loosened tolerance).
    out = jax.block_until_ready(custom_clip_forward(image_features, w1, w2, RATIO))
    assert out.shape == (B, CLIP_OUT)
    assert jnp.allclose(out, ref, atol=5e-3, rtol=5e-2), "bf16-path mismatch vs reference"

    # Full-precision path sanity check (tight tolerance).
    out_f32 = jax.block_until_ready(
        custom_clip_forward(image_features, w1, w2, RATIO, compute_dtype=jnp.float32))
    assert jnp.allclose(out_f32, ref, atol=1e-5, rtol=1e-5), "f32-path mismatch vs reference"

    print("KERNEL_OK")
</pallas_src>

<mosaic_0001>
module attributes {stable_mosaic.version = 11 : i64} {
  func.func @_custom_clip_kernel(%arg0: i32, %arg1: memref<16x512xbf16, #tpu.memory_space<vmem>>, %arg2: memref<512x128xbf16, #tpu.memory_space<vmem>>, %arg3: memref<128x512xbf16, #tpu.memory_space<vmem>>, %arg4: memref<16x512xf32, #tpu.memory_space<vmem>>) attributes {dimension_semantics = [#tpu.dimension_semantics<parallel>], iteration_bounds = array<i64: 2>, scalar_prefetch = 0 : i64, scratch_operands = 0 : i64, tpu.core_type = #tpu.core_type<tc>, window_params = [{transform_indices = @transform_0, window_bounds = array<i64: 16, 512>}, {pipeline_mode = #tpu.pipeline_mode<synchronous>, transform_indices = @transform_1, window_bounds = array<i64: 512, 128>}, {pipeline_mode = #tpu.pipeline_mode<synchronous>, transform_indices = @transform_2, window_bounds = array<i64: 128, 512>}, {transform_indices = @transform_3, window_bounds = array<i64: 16, 512>}]} {
    %c0 = arith.constant 0 : index
    %c0_0 = arith.constant 0 : index
    %0 = vector.load %arg1[%c0, %c0_0] : memref<16x512xbf16, #tpu.memory_space<vmem>>, vector<16x512xbf16>
    %c0_1 = arith.constant 0 : index
    %c0_2 = arith.constant 0 : index
    %1 = vector.load %arg2[%c0_1, %c0_2] : memref<512x128xbf16, #tpu.memory_space<vmem>>, vector<512x128xbf16>
    %cst = arith.constant dense<0.000000e+00> : vector<16x128xf32>
    %2 = tpu.matmul %0, %1, %cst {dimension_numbers = #tpu.dot_dimension_numbers<[1], [0], [0], [1], [0, 0, 1, 1], [], []>} : vector<16x512xbf16>, vector<512x128xbf16>, vector<16x128xf32> -> vector<16x128xf32>
    %cst_3 = arith.constant 0.000000e+00 : f32
    %3 = vector.broadcast %cst_3 : f32 to vector<16x128xf32>
    %4 = arith.maximumf %2, %3 : vector<16x128xf32>
    %5 = arith.truncf %4 : vector<16x128xf32> to vector<16x128xbf16>
    %c0_4 = arith.constant 0 : index
    %c0_5 = arith.constant 0 : index
    %6 = vector.load %arg3[%c0_4, %c0_5] : memref<128x512xbf16, #tpu.memory_space<vmem>>, vector<128x512xbf16>
    %cst_6 = arith.constant dense<0.000000e+00> : vector<16x512xf32>
    %7 = tpu.matmul %5, %6, %cst_6 {dimension_numbers = #tpu.dot_dimension_numbers<[1], [0], [0], [1], [0, 0, 1, 1], [], []>} : vector<16x128xbf16>, vector<128x512xbf16>, vector<16x512xf32> -> vector<16x512xf32>
    %cst_7 = arith.constant 0.000000e+00 : f32
    %8 = vector.broadcast %cst_7 : f32 to vector<16x512xf32>
    %9 = arith.maximumf %7, %8 : vector<16x512xf32>
    %10 = arith.extf %0 : vector<16x512xbf16> to vector<16x512xf32>
    %cst_8 = arith.constant 2.000000e-01 : f32
    %11 = vector.broadcast %cst_8 : f32 to vector<16x512xf32>
    %12 = arith.mulf %11, %9 : vector<16x512xf32>
    %cst_9 = arith.constant 8.000000e-01 : f32
    %13 = vector.broadcast %cst_9 : f32 to vector<16x512xf32>
    %14 = arith.mulf %13, %10 : vector<16x512xf32>
    %15 = arith.addf %12, %14 : vector<16x512xf32>
    %16 = arith.mulf %15, %15 : vector<16x512xf32>
    %cst_10 = arith.constant dense<0.000000e+00> : vector<16xf32>
    %17 = vector.multi_reduction <add>, %16, %cst_10 [1] : vector<16x512xf32> to vector<16xf32>
    %18 = vector.shape_cast %17 : vector<16xf32> to vector<16x1xf32>
    %cst_11 = arith.constant 9.99999996E-13 : f32
    %19 = vector.broadcast %cst_11 : f32 to vector<16x1xf32>
    %20 = arith.addf %18, %19 : vector<16x1xf32>
    %21 = math.rsqrt %20 : vector<16x1xf32>
    %22 = vector.broadcast %21 : vector<16x1xf32> to vector<16x512xf32>
    %23 = arith.mulf %15, %22 : vector<16x512xf32>
    %c0_12 = arith.constant 0 : index
    %c0_13 = arith.constant 0 : index
    %24 = vector.load %arg4[%c0_12, %c0_13] : memref<16x512xf32, #tpu.memory_space<vmem>>, vector<16x512xf32>
    tpu.vector_store %arg4[%c0_12, %c0_13], %23 {strides = array<i32>} : memref<16x512xf32, #tpu.memory_space<vmem>>, vector<16x512xf32>,
    return
  }
  func.func @transform_0(%arg0: i32) -> (i32, i32) {
    %c0_i32 = arith.constant 0 : i32
    %c0_i32_0 = arith.constant 0 : i32
    return %arg0, %c0_i32 : i32, i32
  }
  func.func @transform_1(%arg0: i32) -> (i32, i32) {
    %c0_i32 = arith.constant 0 : i32
    %c0_i32_0 = arith.constant 0 : i32
    %c0_i32_1 = arith.constant 0 : i32
    return %c0_i32, %c0_i32_0 : i32, i32
  }
  func.func @transform_2(%arg0: i32) -> (i32, i32) {
    %c0_i32 = arith.constant 0 : i32
    %c0_i32_0 = arith.constant 0 : i32
    %c0_i32_1 = arith.constant 0 : i32
    return %c0_i32, %c0_i32_0 : i32, i32
  }
  func.func @transform_3(%arg0: i32) -> (i32, i32) {
    %c0_i32 = arith.constant 0 : i32
    %c0_i32_0 = arith.constant 0 : i32
    return %arg0, %c0_i32 : i32, i32
  }
}

</mosaic_0001>

<bundles_post_ra>
// kernel: tpu_custom_call.1
= control target key start
LH: loop header
LB: loop body
LE: loop exit
PB: predicated region body
PF: predicated region fallthrough
CT: control target
= control target key end

     0   :  { %8 = vsyncpa [#allocation3], 0  ;;  %s1754_s0 = inlined_call_operand.hbm [shape: bf16[32,512], index: 0, kind: input, shape index: {}]   ;;  %s1755_s1 = inlined_call_operand.hbm [shape: bf16[512,128], index: 1, kind: input, shape index: {}]   ;;  %s1756_s2 = inlined_call_operand.hbm [shape: bf16[128,512], index: 2, kind: input, shape index: {}]   ;;  %s1757_s3 = inlined_call_operand.hbm [shape: f32[32,512], index: 3, kind: output, shape index: {}]  }
   0x1   :  { %10 = vsyncpa [#allocation3 + $0x1], 0 }
   0x2   :  { %11 = vsyncpa [#allocation6], 0 }
   0x3   :  { %12 = vsyncpa [#allocation4], 0 }
   0x4   :  { %14 = vsyncpa [#allocation4 + $0x1], 0  ;;  %s1529_s12 = smov 0   ;;  %s1531_s13 = smov 0  }
   0x5   :  { %s1533_s14 = smov 0   ;;  %s1535_s15 = smov 0  }
   0x6 LB: > { %s1550_s16 = sadd.s32 4294967295, %s1496_s15   ;;  %s1050_s17 = sadd.s32 4294967294, %s1496_s15   ;;  %s1496_s15 = sphi %s1535_s15, %s1779_s15   ;;  %s1492_s14 = sphi %s1533_s14, %s1778_s14   ;;  %s1488_s13 = sphi %s1531_s13, %s1777_s13   ;;  %s1484_s12 = sphi %s1529_s12, %s1776_s12  }
   0x7   : > { %p40_p0 = scmp.ne.s32.totalorder %s1488_s13, %s1484_s12  ;;  %p1758_p1 = scmp.eq.s32.totalorder %s1550_s16, 0 }
   0x8   : > { %p112_p3 = scmp.eq.s32.totalorder %s1050_s17, 1  ;;  %p1051_p5 = scmp.ge.s32.totalorder %s1496_s15, 1 }
   0x9   : > { %p1559_p4 = por %p1758_p1, %p40_p0  ;;  %p119_p7 = scmp.lt.s32.totalorder %s1496_s15, 3 }
   0xa   : > { %p1564_p6 = por %p112_p3, %p40_p0  ;;  %s1498_s21 = smov [#allocation5]  }
   0xb   : > { %s1762_s18 = scalar_select %p1559_p4, 1, 0 }
   0xc   : > { %s1763_s19 = scalar_select %p1564_p6, 1, 0 }
   0xd   : > { %p1569_p8 = pnand %p1051_p5, %p119_p7  ;;  %s131_s22 = sshll.u32 %s1498_s21, 4  ;;  %s132_s22 = int_to_ptr.vmem [resolvable:$true] %s131_s22 }
   0xe   : > { %s1499_s24 = smov [#allocation7]   ;;  %s1359_s26 = scalar_lea.vmem %s132_s22, 4096 }
   0xf   : > { %s1764_s20 = scalar_select %p1569_p8, 1, 0 }
  0x10   : > { %p1198_p9 = pneg %p1569_p8  ;;  %s144_s25 = sshll.u32 %s1499_s24, 4  ;;  %s145_s25 = int_to_ptr.vmem [resolvable:$true] %s144_s25 }
  0x11   : > { %p1360_p13 = scmp.ne.s32.totalorder %s132_s22, %s1359_s26  ;;  %p1367_p5 = scmp.lt.s32.totalorder %s132_s22, %s132_s22 }
  0x12   : > { %p1578_p11 = pnand %p1198_p9, %p1758_p1  ;;  %p1368_p7 = scmp.lt.s32.totalorder %s1359_s26, %s1359_s26 }
  0x14   : > { %p1350_p12 = pneg %p1578_p11  ;;  %p1369_p10 = por %p1368_p7, %p1367_p5 }
  0x16   : > { %p1362_p0 = pnand %p1360_p13, %p1350_p12 }
  0x18   : > { %p1363_p3 = pneg %p1362_p0 }
  0x1a   : > { %p1370_p9 = pnand %p1369_p10, %p1363_p3 }
  0x1c   : > { %1373 = shalt.err (!%p1370_p9)
}
  0x1d   : > { %s1500_s27 = smov 64   ;;  %s1501_s28 = smov 4  }
  0x1e   : > { %1201 = dma.hbm_to_vmem [thread:$0]  (!%p1578_p11), %s1755_s1, 4096, %s132_s22, [#allocation6], %s1500_s27, %s1500_s27, %s1501_s28  }
  0x1f   : > { %s1385_s4 = scalar_lea.vmem %s145_s25, 4096  ;;  %p1393_p2 = scmp.lt.s32.totalorder %s145_s25, %s145_s25 }
  0x20   : > { %p1386_p1 = scmp.ne.s32.totalorder %s145_s25, %s1385_s4  ;;  %p1394_p6 = scmp.lt.s32.totalorder %s1385_s4, %s1385_s4 }
  0x22   : > { %p1388_p13 = pnand %p1386_p1, %p1350_p12  ;;  %p1395_p5 = por %p1394_p6, %p1393_p2 }
  0x24   : > { %p1389_p0 = pneg %p1388_p13 }
  0x26   : > { %p1396_p10 = pnand %p1395_p5, %p1389_p0 }
  0x28   : > { %1399 = shalt.err (!%p1396_p10)
}
  0x29   : > { %s1502_s5 = smov 256   ;;  %s1503_s6 = smov 16  }
  0x2a   : > { %1204 = dma.hbm_to_vmem [thread:$0]  (!%p1578_p11), %s1756_s2, 4096, %s145_s25, [#allocation6], %s1502_s5, %s1502_s5, %s1503_s6  }
  0x2b   : > { %s1604_s9 = sadd.s32 1, %s1496_s15   ;;  %s27_s11 = sadd.s32 1, %s1492_s14 }
  0x2c   : > { %s24_s10 = ssub.s32 %s1496_s15, %s1604_s9  ;;  %p34_p2 = scmp.ne.s32.totalorder %s1492_s14, %s1488_s13 }
  0x2d   : > { %p25_p1 = scmp.eq.s32.totalorder %s24_s10, 0  ;;  %p35_p6 = scmp.eq.s32.totalorder %s1496_s15, 0 }
  0x2e   : > { %p1766_p3 = scmp.eq.s32.totalorder %s1550_s16, 1  ;;  %p1215_p9 = scmp.lt.s32.totalorder %s1496_s15, 2 }
  0x2f   : > { %s1613_s17 = scalar_select %p25_p1, %s1492_s14, %s27_s11  }
  0x30   : > { %p36_p12 = por %p35_p6, %p34_p2  ;;  %p1617_p7 = por %p1766_p3, %p34_p2 }
  0x31   : > { %s158_s22 = sand.u32 1, %s1492_s14   ;;  %s1139_s24 = sshll.u32 %s1496_s15, 9 }
  0x32   : > { %s1767_s21 = scalar_select %p1617_p7, 1, 0 }
  0x33   : > { %s1055_s23 = sshll.u32 %s158_s22, 5  ;;  %s1627_s27 = scalar_lea.hbm %s1754_s0, %s1139_s24 }
  0x34   : > { %s162_s28 = scalar_lea.vmem [#allocation2], %s1055_s23  ;;  %p1631_p11 = pnand %p1215_p9, %p36_p12 }
  0x35   : > { %s170_s29 = sshll.u32 %s162_s28, 4  ;;  %s1635_s4 = scalar_lea.sflag [#allocation3], %s158_s22  ;;  %s1629_s29 = int_to_ptr.vmem [resolvable:$true] %s170_s29 }
  0x36   : > { %s1400_s7 = scalar_lea.hbm %s1627_s27, 512  ;;  %p1402_p0 = pneg %p1631_p11 }
  0x37   : > { %p1401_p13 = scmp.ne.s32.totalorder %s1627_s27, %s1400_s7  ;;  %s1405_s11 = scalar_lea.hbm %s1754_s0, 1024 }
  0x38   : > { %p1406_p1 = scmp.lt.s32.totalorder %s1627_s27, %s1754_s0  ;;  %p1407_p2 = scmp.lt.s32.totalorder %s1405_s11, %s1400_s7 }
  0x39   : > { %p1403_p5 = pnand %p1402_p0, %p1401_p13 }
  0x3a   : > { %p1408_p6 = por %p1407_p2, %p1406_p1 }
  0x3b   : > { %p1404_p10 = pneg %p1403_p5 }
  0x3d   : > { %p1409_p12 = pnand %p1408_p6, %p1404_p10 }
  0x3f   : > { %1412 = shalt.err (!%p1409_p12)
}
  0x40   : > { %s1413_s22 = scalar_lea.vmem %s1629_s29, 512  ;;  %s1504_s25 = smov [#allocation2]  }
  0x41   : > { %p1414_p3 = scmp.ne.s32.totalorder %s1629_s29, %s1413_s22  ;;  %s1418_s26 = sshll.u32 %s1504_s25, 4  ;;  %s1419_s26 = int_to_ptr.vmem [resolvable:$false] %s1418_s26 }
  0x42   : > { %s1420_s28 = scalar_lea.vmem %s1419_s26, 1024  ;;  %p1421_p5 = scmp.lt.s32.totalorder %s1629_s29, %s1419_s26 }
  0x43   : > { %p1416_p9 = pnand %p1414_p3, %p1402_p0  ;;  %p1422_p7 = scmp.lt.s32.totalorder %s1420_s28, %s1413_s22 }
  0x45   : > { %p1417_p13 = pneg %p1416_p9  ;;  %p1423_p4 = por %p1422_p7, %p1421_p5 }
  0x47   : > { %p1424_p8 = pnand %p1423_p4, %p1417_p13 }
  0x49   : > { %1427 = shalt.err (!%p1424_p8)
}
  0x4a   : > { %1208 = dma.hbm_to_vmem [thread:$0]  (!%p1631_p11), %s1627_s27, 512, %s1629_s29, %s1635_s4, %s1502_s5, %s1502_s5, %s1503_s6  }
  0x4b   : > { %p1769_p0 = scmp.ne.s32.totalorder %s1764_s20, 0 }
  0x4c   : > { %s1662_s7 = sand.u32 (!%p1769_p0), 1, %s1488_s13   ;;  %p1770_p4 = scmp.ne.s32.totalorder (!%p1769_p0), %s1762_s18, 0 }
  0x4d   : > { %182 = sbr.rel (%p1769_p0) target bundleno = 712 (0x2c8), region = 32  ;;  %s1060_s8 = sshll.u32 (!%p1769_p0), %s1662_s7, 5 }
  0x4e   : > { %s185_s10 = scalar_lea.sflag (!%p1769_p0), [#allocation3], %s1662_s7  ;;  %s1666_s11 = scalar_lea.vmem (!%p1769_p0), [#allocation2], %s1060_s8 }
  0x52   : > { %1471 = dma.done.wait (%p1770_p4), %s185_s10, 512  }
  0x53   : > { %1473 = vsyncadd (%p1770_p4), %s185_s10, 4294966784  ;;  %p1771_p8 = scmp.eq.s32.totalorder %s1550_s16, 0 }
  0x55   : > { %1475 = dma.done.wait (%p1771_p8), [#allocation6], 8192   ;;  %p1772_p7 = pmov %p1771_p8 }
  0x56   : > { %v1260_v0 = vld [vmem:[#allocation5 + $0x78] sm:$0xff]   ;;  %v1264_v4 = vld [vmem:[#allocation5 + $0x70] sm:$0xff]   ;;  %v1268_v8 = vld [vmem:[#allocation5 + $0x68] sm:$0xff]   ;;  %s1063_s18 = sshll.u32 %s1662_s7, 6  ;;  %s1141_s20 = sshll.u32 %s1550_s16, 10 }
  0x57   : > { %1477 = vsyncadd (%p1772_p7), [#allocation6], 4294959104  ;;  %v1261_v1 = vld [vmem:[#allocation5 + $0xf8] sm:$0xff]   ;;  %1142 = vmatprep.subr.bf16.mxu0 %v1260_v0  ;;  %v1265_v5 = vld [vmem:[#allocation5 + $0xf0] sm:$0xff]   ;;  %s218_s5 = scalar_lea.vmem [#allocation8], %s1063_s18  ;;  %s1709_s30 = scalar_lea.hbm %s1757_s3, %s1141_s20 }
  0x58   : > { %v1262_v2 = vld [vmem:[#allocation5 + $0x38] sm:$0xff]   ;;  %1164 = vmatprep.subr.bf16.mxu1 %v1261_v1  ;;  %v1266_v6 = vld [vmem:[#allocation5 + $0x30] sm:$0xff]   ;;  %v1269_v9 = vld [vmem:[#allocation5 + $0xe8] sm:$0xff]   ;;  %s958_s6 = sshll.u32 %s218_s5, 4  ;;  %s944_s16 = scalar_lea.sflag [#allocation4], %s1662_s7  ;;  %s1711_s6 = int_to_ptr.vmem [resolvable:$true] %s958_s6 }
  0x59   : > { %v1263_v3 = vld [vmem:[#allocation5 + $0xb8] sm:$0xff]   ;;  %1143 = vmatpush3.bf16.msra.mxu0 %v1262_v2  ;;  %v1267_v7 = vld [vmem:[#allocation5 + $0xb0] sm:$0xff]   ;;  %v1270_v10 = vld [vmem:[#allocation5 + $0x28] sm:$0xff]   ;;  %s1428_s4 = scalar_lea.vmem %s1711_s6, 1024  ;;  %p1773_p10 = scmp.ne.s32.totalorder %s1767_s21, 0 }
  0x5a   : > { %1165 = vmatpush3.bf16.msra.mxu1 %v1263_v3  ;;  %1144 = vmatprep.subr.bf16.mxu0 %v1264_v4  ;;  %v1271_v11 = vld [vmem:[#allocation5 + $0xa8] sm:$0xff]   ;;  %v1272_v12 = vld [vmem:[#allocation5 + $0x60] sm:$0xff]   ;;  %v1276_v16 = vld [vmem:[#allocation5 + $0x58] sm:$0xff]   ;;  %p1429_p11 = scmp.ne.s32.totalorder %s1711_s6, %s1428_s4  ;;  %s1506_s23 = smov [#allocation8]  }
  0x5b   : > { %1166 = vmatprep.subr.bf16.mxu1 %v1265_v5  ;;  %v1273_v13 = vld [vmem:[#allocation5 + $0xe0] sm:$0xff]   ;;  %v1277_v17 = vld [vmem:[#allocation5 + $0xd8] sm:$0xff]   ;;  %v1280_v20 = vld [vmem:[#allocation5 + $0x50] sm:$0xff]   ;;  %s1432_s24 = sshll.u32 %s1506_s23, 4  ;;  %s1433_s24 = int_to_ptr.vmem [resolvable:$false] %s1432_s24 }
  0x5c   : > { %v1274_v14 = vld [vmem:[#allocation5 + $0x20] sm:$0xff]   ;;  %v1278_v18 = vld [vmem:[#allocation5 + $0x18] sm:$0xff]   ;;  %v1281_v21 = vld [vmem:[#allocation5 + $0xd0] sm:$0xff]   ;;  %p1430_p1 = pnand %p1429_p11, %p1773_p10  ;;  %s1434_s22 = scalar_lea.vmem %s1433_s24, 2048 }
  0x5d   : > { %1145 = vmatpush3.bf16.msra.mxu0 %v1266_v6  ;;  %v1275_v15 = vld [vmem:[#allocation5 + $0xa0] sm:$0xff]   ;;  %v1279_v19 = vld [vmem:[#allocation5 + $0x98] sm:$0xff]   ;;  %v1282_v22 = vld [vmem:[#allocation5 + $0x10] sm:$0xff]   ;;  %p1435_p6 = scmp.lt.s32.totalorder %s1711_s6, %s1433_s24  ;;  %p1436_p12 = scmp.lt.s32.totalorder %s1434_s22, %s1428_s4 }
  0x5e   : > { %1167 = vmatpush3.bf16.msra.mxu1 %v1267_v7  ;;  %1146 = vmatprep.subr.bf16.mxu0 %v1268_v8  ;;  %v1283_v23 = vld [vmem:[#allocation5 + $0x90] sm:$0xff]   ;;  %v1284_v24 = vld [vmem:[#allocation5 + $0x48] sm:$0xff]   ;;  %v1288_v28 = vld [vmem:[#allocation5 + $0x40] sm:$0xff]   ;;  %v1505_v8 = vmov 0   ;;  %p1431_p2 = pneg %p1430_p1 }
  0x5f   : > { %1168 = vmatprep.subr.bf16.mxu1 %v1269_v9  ;;  %v1285_v25 = vld [vmem:[#allocation5 + $0xc8] sm:$0xff]   ;;  %v1289_v29 = vld [vmem:[#allocation5 + $0xc0] sm:$0xff]   ;;  %v1680_v33 = vld [vmem:[%s1666_s11 + $0x10] sm:$0xff]  ;;  %p1437_p3 = por %p1436_p12, %p1435_p6 }
  0x60   : > { %v1286_v26 = vld [vmem:[#allocation5 + $0x8] sm:$0xff]   ;;  %v1290_v30 = vld [vmem:[#allocation5] sm:$0xff]   ;;  %v1688_v36 = vld [vmem:[%s1666_s11 + $0x18] sm:$0xff] }
  0x61   : > { %1147 = vmatpush3.bf16.msra.mxu0 %v1270_v10  ;;  %v1287_v27 = vld [vmem:[#allocation5 + $0x88] sm:$0xff]   ;;  %v1291_v31 = vld [vmem:[#allocation5 + $0x80] sm:$0xff]   ;;  %p1438_p9 = pnand %p1437_p3, %p1431_p2 }
  0x62   : > { %1169 = vmatpush3.bf16.msra.mxu1 %v1271_v11  ;;  %1148 = vmatprep.subr.bf16.mxu0 %v1272_v12  ;;  %v1677_v32 = vld [vmem:[%s1666_s11] sm:$0xff]  ;;  %v1683_v34 = vld [vmem:[%s1666_s11 + $0x8] sm:$0xff] }
  0x63   : > { %1170 = vmatprep.subr.bf16.mxu1 %v1273_v13  ;;  %v1065_v35 = vcombine.high %v1677_v32, %v1680_v33  ;;  %v1064_v37 = vcombine.low %v1677_v32, %v1680_v33  ;;  %v1067_v38 = vcombine.high %v1683_v34, %v1688_v36  ;;  %v1066_v39 = vcombine.low %v1683_v34, %v1688_v36  ;;  %v1296_v40 = vld [vmem:[#allocation7 + $0xe0] ss:$16 sps:$4 sm:$0xff]   ;;  %v1298_v41 = vld [vmem:[#allocation7 + $0xe4] ss:$16 sps:$4 sm:$0xff]   ;;  %v1299_v42 = vld [vmem:[#allocation7 + $0xe8] ss:$16 sps:$4 sm:$0xff]  }
  0x64   : > { %v1301_v43 = vld [vmem:[#allocation7 + $0xec] ss:$16 sps:$4 sm:$0xff]   ;;  %v1304_v44 = vld [vmem:[#allocation7 + $0xc4] ss:$16 sps:$4 sm:$0xff]   ;;  %v1302_v45 = vld [vmem:[#allocation7 + $0xc0] ss:$16 sps:$4 sm:$0xff]  }
  0x65   : > { %1149 = vmatpush3.bf16.msra.mxu0 %v1274_v14  ;;  %534 = vmatprep.mubr.bf16.mxu0 %v1065_v35  ;;  %v1307_v46 = vld [vmem:[#allocation7 + $0xcc] ss:$16 sps:$4 sm:$0xff]   ;;  %v1305_v47 = vld [vmem:[#allocation7 + $0xc8] ss:$16 sps:$4 sm:$0xff]   ;;  %v1310_v48 = vld [vmem:[#allocation7 + $0xa4] ss:$16 sps:$4 sm:$0xff]  }
  0x66   : > { %1171 = vmatpush3.bf16.msra.mxu1 %v1275_v15  ;;  %1150 = vmatprep.subr.bf16.mxu0 %v1276_v16  ;;  %v1313_v49 = vld [vmem:[#allocation7 + $0xac] ss:$16 sps:$4 sm:$0xff]   ;;  %v1308_v50 = vld [vmem:[#allocation7 + $0xa0] ss:$16 sps:$4 sm:$0xff]   ;;  %v1311_v51 = vld [vmem:[#allocation7 + $0xa8] ss:$16 sps:$4 sm:$0xff]  }
  0x67   : > { %1172 = vmatprep.subr.bf16.mxu1 %v1277_v17  ;;  %575 = vmatprep.mubr.bf16.mxu1 %v1067_v38  ;;  %v1316_v52 = vld [vmem:[#allocation7 + $0x84] ss:$16 sps:$4 sm:$0xff]   ;;  %v1314_v53 = vld [vmem:[#allocation7 + $0x80] ss:$16 sps:$4 sm:$0xff]   ;;  %v1319_v54 = vld [vmem:[#allocation7 + $0x8c] ss:$16 sps:$4 sm:$0xff]  }
  0x68   : > { %v1317_v55 = vld [vmem:[#allocation7 + $0x88] ss:$16 sps:$4 sm:$0xff]   ;;  %v1322_v56 = vld [vmem:[#allocation7 + $0x64] ss:$16 sps:$4 sm:$0xff]   ;;  %v1325_v57 = vld [vmem:[#allocation7 + $0x6c] ss:$16 sps:$4 sm:$0xff]  }
  0x69   : > { %1151 = vmatpush3.bf16.msra.mxu0 %v1278_v18  ;;  %v1320_v58 = vld [vmem:[#allocation7 + $0x60] ss:$16 sps:$4 sm:$0xff]   ;;  %v1323_v59 = vld [vmem:[#allocation7 + $0x68] ss:$16 sps:$4 sm:$0xff]   ;;  %v1328_v60 = vld [vmem:[#allocation7 + $0x44] ss:$16 sps:$4 sm:$0xff]  }
  0x6a   : > { %1173 = vmatpush3.bf16.msra.mxu1 %v1279_v19  ;;  %1152 = vmatprep.subr.bf16.mxu0 %v1280_v20  ;;  %v1331_v61 = vld [vmem:[#allocation7 + $0x4c] ss:$16 sps:$4 sm:$0xff]   ;;  %v1326_v62 = vld [vmem:[#allocation7 + $0x40] ss:$16 sps:$4 sm:$0xff]   ;;  %v1329_v63 = vld [vmem:[#allocation7 + $0x48] ss:$16 sps:$4 sm:$0xff]  }
  0x6b   : > { %1174 = vmatprep.subr.bf16.mxu1 %v1281_v21  ;;  %v1334_v0 = vld [vmem:[#allocation7 + $0x24] ss:$16 sps:$4 sm:$0xff]   ;;  %v1337_v1 = vld [vmem:[#allocation7 + $0x2c] ss:$16 sps:$4 sm:$0xff]   ;;  %v1332_v2 = vld [vmem:[#allocation7 + $0x20] ss:$16 sps:$4 sm:$0xff]  }
  0x6c   : > { %v1335_v3 = vld [vmem:[#allocation7 + $0x28] ss:$16 sps:$4 sm:$0xff]   ;;  %v1340_v4 = vld [vmem:[#allocation7 + $0x4] ss:$16 sps:$4 sm:$0xff]   ;;  %v1343_v5 = vld [vmem:[#allocation7 + $0xc] ss:$16 sps:$4 sm:$0xff]  }
  0x6d   : > { %1153 = vmatpush3.bf16.msra.mxu0 %v1282_v22  ;;  %v1338_v6 = vld [vmem:[#allocation7] ss:$16 sps:$4 sm:$0xff]   ;;  %v1341_v7 = vld [vmem:[#allocation7 + $0x8] ss:$16 sps:$4 sm:$0xff]  }
  0x6e   : > { %1175 = vmatpush3.bf16.msra.mxu1 %v1283_v23  ;;  %1154 = vmatprep.subr.bf16.mxu0 %v1284_v24 }
  0x6f   : > { %1176 = vmatprep.subr.bf16.mxu1 %v1285_v25 }
  0x71   : > { %1155 = vmatpush3.bf16.msra.mxu0 %v1286_v26  ;;  %v873_v26 = vunpack.c.l.bf16 %v1677_v32 }
  0x72   : > { %1177 = vmatpush3.bf16.msra.mxu1 %v1287_v27  ;;  %1156 = vmatprep.subr.bf16.mxu0 %v1288_v28  ;;  %v875_v27 = vunpack.c.l.bf16 %v1683_v34  ;;  %v874_v28 = vunpack.c.h.bf16 %v1677_v32 }
  0x73   : > { %1178 = vmatprep.subr.bf16.mxu1 %v1289_v29 }
  0x75   : > { %1157 = vmatpush3.bf16.msra.mxu0 %v1290_v30 }
  0x76   : > { %1179 = vmatpush3.bf16.msra.mxu1 %v1291_v31  ;;  %779 = vmatprep.subr.bf16.mxu0 %v1298_v41  ;;  %v876_v31 = vunpack.c.h.bf16 %v1683_v34  ;;  %v890_v41 = vmul.f32 0.8, %v874_v28 }
  0x77   : > { %822 = vmatprep.subr.bf16.mxu1 %v1301_v43  ;;  %v877_v43 = vunpack.c.l.bf16 %v1680_v33 }
  0x78   : > { %535 = vmatmul.mubr.bf16.vlgmr.msra.gmra.mxu0 %v1064_v37  ;;  %v889_v37 = vmul.f32 0.8, %v873_v26 }
  0x79   : > { %576 = vmatmul.mubr.bf16.vlgmr.msra.gmra.mxu1 %v1066_v39  ;;  %780 = vmatpush1.bf16.msra.mxu0 %v1296_v40  ;;  %v891_v39 = vmul.f32 0.8, %v875_v27 }
  0x7a   : > { %823 = vmatpush1.bf16.msra.mxu1 %v1299_v42  ;;  %781 = vmatprep.subr.bf16.mxu0 %v1304_v44  ;;  %v879_v44 = vunpack.c.l.bf16 %v1688_v36 }
  0x7b   : > { %824 = vmatprep.subr.bf16.mxu1 %v1307_v46  ;;  %811 = vmatprep.mubr.bf16.mxu0 %v1505_v8 }
  0x7c   : > { %854 = vmatprep.mubr.bf16.mxu1 %v1505_v8 }
  0x7d   : > { %782 = vmatpush1.bf16.msra.mxu0 %v1302_v45  ;;  %v878_v45 = vunpack.c.h.bf16 %v1680_v33 }
  0x7e   : > { %825 = vmatpush1.bf16.msra.mxu1 %v1305_v47  ;;  %783 = vmatprep.subr.bf16.mxu0 %v1310_v48 }
  0x7f   : > { %826 = vmatprep.subr.bf16.mxu1 %v1313_v49  ;;  %v892_v49 = vmul.f32 0.8, %v876_v31 }
  0x81   : > { %784 = vmatpush1.bf16.msra.mxu0 %v1308_v50 }
  0x82   : > { %827 = vmatpush1.bf16.msra.mxu1 %v1311_v51  ;;  %785 = vmatprep.subr.bf16.mxu0 %v1316_v52 }
  0x83   : > { %828 = vmatprep.subr.bf16.mxu1 %v1319_v54  ;;  %v880_v54 = vunpack.c.h.bf16 %v1688_v36 }
  0x85   : > { %786 = vmatpush1.bf16.msra.mxu0 %v1314_v53 }
  0x86   : > { %829 = vmatpush1.bf16.msra.mxu1 %v1317_v55  ;;  %787 = vmatprep.subr.bf16.mxu0 %v1322_v56  ;;  %v893_v56 = vmul.f32 0.8, %v877_v43 }
  0x87   : > { %830 = vmatprep.subr.bf16.mxu1 %v1325_v57 }
  0x89   : > { %788 = vmatpush1.bf16.msra.mxu0 %v1320_v58  ;;  %v895_v58 = vmul.f32 0.8, %v879_v44 }
  0x8a   : > { %831 = vmatpush1.bf16.msra.mxu1 %v1323_v59  ;;  %789 = vmatprep.subr.bf16.mxu0 %v1328_v60 }
  0x8b   : > { %832 = vmatprep.subr.bf16.mxu1 %v1331_v61 }
  0x8d   : > { %790 = vmatpush1.bf16.msra.mxu0 %v1326_v62 }
  0x8e   : > { %833 = vmatpush1.bf16.msra.mxu1 %v1329_v63  ;;  %791 = vmatprep.subr.bf16.mxu0 %v1334_v0  ;;  %v894_v63 = vmul.f32 0.8, %v878_v45 }
  0x8f   : > { %834 = vmatprep.subr.bf16.mxu1 %v1337_v1 }
  0x91   : > { %792 = vmatpush1.bf16.msra.mxu0 %v1332_v2 }
  0x92   : > { %835 = vmatpush1.bf16.msra.mxu1 %v1335_v3  ;;  %793 = vmatprep.subr.bf16.mxu0 %v1340_v4 }
  0x93   : > { %836 = vmatprep.subr.bf16.mxu1 %v1343_v5 }
  0x95   : > { %794 = vmatpush1.bf16.msra.mxu0 %v1338_v6 }
  0x96   : > { %837 = vmatpush1.bf16.msra.mxu1 %v1341_v7  ;;  %v896_v7 = vmul.f32 0.8, %v880_v54 }
 0x138   : > { %v1158_v9 = vpop.f32.mrf.mxu0 }
 0x139   : > { %v1180_v10 = vpop.f32.mrf.mxu1 }
 0x13a   : > { %v1159_v11 = vpop.f32.mrf.mxu0 }
 0x13b   : > { %v1181_v12 = vpop.f32.mrf.mxu1  ;;  %v1160_v13 = vadd.f32 %v1159_v11, %v1158_v9 }
 0x13c   : > { %v1182_v14 = vadd.f32 %v1181_v12, %v1180_v10  ;;  %v1161_v15 = vpop.f32.mrf.mxu0 }
 0x13d   : > { %v1183_v16 = vpop.f32.mrf.mxu1 }
 0x13e   : > { %v1162_v17 = vpop.f32.mrf.mxu0  ;;  %v578_v20 = vadd.f32 %v1182_v14, %v1160_v13 }
 0x13f   : > { %v1163_v18 = vadd.f32 %v1162_v17, %v1161_v15  ;;  %v1184_v19 = vpop.f32.mrf.mxu1 }
 0x140   : > { %v1185_v21 = vadd.f32 %v1184_v19, %v1183_v16  ;;  %v584_v23 = vmax.f32 %v578_v20, 0.0 }
 0x142   : > { %v581_v22 = vadd.f32 %v1185_v21, %v1163_v18 }
 0x144   : > { %v585_v24 = vmax.f32 %v581_v22, 0.0 }
 0x146   : > { %v586_v25 = vpack.c.bf16 %v585_v24, %v584_v23 }
 0x148   : > { %812 = vmatmul.mubr.bf16.vlgmr.msra.gmra.mxu0 %v586_v25  ;;  %855 = vmatmul.mubr.bf16.vlgmr.msra.gmra.mxu1 %v586_v25 }
 0x208   : > { %v813_v29 = vpop.f32.mrf.mxu0  ;;  %v856_v30 = vpop.f32.mrf.mxu1 }
 0x209   : > { %v865_v35 = vmax.f32 %v813_v29, 0.0  ;;  %v867_v38 = vmax.f32 %v856_v30, 0.0 }
 0x20a   : > { %v815_v40 = vpop.f32.mrf.mxu0  ;;  %v858_v42 = vpop.f32.mrf.mxu1 }
 0x20b   : > { %v881_v46 = vmul.f32 0.2, %v865_v35  ;;  %v883_v47 = vmul.f32 0.2, %v867_v38  ;;  %v866_v32 = vmax.f32 %v815_v40, 0.0  ;;  %v868_v48 = vmax.f32 %v858_v42, 0.0 }
 0x20c   : > { %v817_v50 = vpop.f32.mrf.mxu0  ;;  %v860_v34 = vpop.f32.mrf.mxu1 }
 0x20d   : > { %v897_v51 = vadd.f32 %v889_v37, %v881_v46  ;;  %v882_v52 = vmul.f32 0.2, %v866_v32  ;;  %v884_v53 = vmul.f32 0.2, %v868_v48  ;;  %v869_v55 = vmax.f32 %v817_v50, 0.0 }
 0x20e   : > { %v871_v57 = vmax.f32 %v860_v34, 0.0  ;;  %v819_v59 = vpop.f32.mrf.mxu0  ;;  %v862_v60 = vpop.f32.mrf.mxu1  ;;  %v899_v61 = vadd.f32 %v891_v39, %v883_v47 }
 0x20f   : > { %v898_v33 = vadd.f32 %v890_v41, %v882_v52  ;;  %v870_v62 = vmax.f32 %v819_v59, 0.0  ;;  %v900_v0 = vadd.f32 %v892_v49, %v884_v53  ;;  %v885_v1 = vmul.f32 0.2, %v869_v55 }
 0x210   : > { %v887_v2 = vmul.f32 0.2, %v871_v57  ;;  %v872_v3 = vmax.f32 %v862_v60, 0.0  ;;  %v905_v4 = vmul.f32 %v897_v51, %v897_v51  ;;  %v907_v11 = vmul.f32 %v899_v61, %v899_v61 }
 0x211   : > { %v906_v5 = vmul.f32 %v898_v33, %v898_v33  ;;  %v886_v6 = vmul.f32 0.2, %v870_v62  ;;  %v901_v8 = vadd.f32 %v893_v56, %v885_v1  ;;  %v908_v13 = vmul.f32 %v900_v0, %v900_v0 }
 0x212   : > { %v888_v36 = vmul.f32 0.2, %v872_v3  ;;  %v903_v9 = vadd.f32 %v895_v58, %v887_v2 }
 0x213   : > { %v902_v10 = vadd.f32 %v894_v63, %v886_v6  ;;  %v913_v12 = vadd.f32 %v906_v5, %v905_v4  ;;  %v909_v14 = vmul.f32 %v901_v8, %v901_v8 }
 0x214   : > { %v904_v16 = vadd.f32 %v896_v7, %v888_v36  ;;  %v911_v18 = vmul.f32 %v903_v9, %v903_v9 }
 0x215   : > { %v910_v15 = vmul.f32 %v902_v10, %v902_v10  ;;  %v914_v17 = vadd.f32 %v913_v12, %v907_v11 }
 0x216   : > { %v912_v21 = vmul.f32 %v904_v16, %v904_v16 }
 0x217   : > { %v915_v19 = vadd.f32 %v914_v17, %v908_v13  ;;  %v918_v20 = vadd.f32 %v910_v15, %v909_v14 }
 0x219   : > { %916 = vadd.xlane.f32.xlu0 %v915_v19  ;;  %v919_v22 = vadd.f32 %v918_v20, %v911_v18 }
 0x21b   : > { %v920_v23 = vadd.f32 %v919_v22, %v912_v21 }
 0x21d   : > { %921 = vadd.xlane.f32.xlu0 %v920_v23 }
 0x2a2   : > { %v917_v24 = vpop.xlane.xlu0 %916 }
 0x2a3   : > { %v923_v25 = vadd.f32 1e-12, %v917_v24 }
 0x2a5   : > { %1344 = vrsqrt.f32 %v923_v25 }
 0x2a6   : > { %v922_v26 = vpop.xlane.xlu0 %921 }
 0x2a7   : > { %v924_v27 = vadd.f32 1e-12, %v922_v26 }
 0x2a9   : > { %1346 = vrsqrt.f32 %v924_v27 }
 0x2b2   : > { %v1345_v28 = vpop.eup %1344 }
 0x2b3   : > { %v927_v29 = vmul.f32 %v1345_v28, %v897_v51  ;;  %v928_v30 = vmul.f32 %v1345_v28, %v898_v33  ;;  %v929_v31 = vmul.f32 %v1345_v28, %v899_v61  ;;  %v930_v35 = vmul.f32 %v1345_v28, %v900_v0 }
 0x2b5   : > { %935 = vst [vmem:[%s218_s5] sm:$0xff] %v927_v29  ;;  %936 = vst [vmem:[%s218_s5 + $0x8] sm:$0xff] %v928_v30 }
 0x2b6   : > { %937 = vst [vmem:[%s218_s5 + $0x10] sm:$0xff] %v929_v31  ;;  %938 = vst [vmem:[%s218_s5 + $0x18] sm:$0xff] %v930_v35  ;;  %v1347_v37 = vpop.eup %1346 }
 0x2b7   : > { %v931_v38 = vmul.f32 %v1347_v37, %v901_v8  ;;  %v932_v39 = vmul.f32 %v1347_v37, %v902_v10  ;;  %v933_v40 = vmul.f32 %v1347_v37, %v903_v9  ;;  %v934_v41 = vmul.f32 %v1347_v37, %v904_v16 }
 0x2b9   : > { %939 = vst [vmem:[%s218_s5 + $0x20] sm:$0xff] %v931_v38  ;;  %940 = vst [vmem:[%s218_s5 + $0x28] sm:$0xff] %v932_v39 }
 0x2ba   : > { %941 = vst [vmem:[%s218_s5 + $0x30] sm:$0xff] %v933_v40  ;;  %942 = vst [vmem:[%s218_s5 + $0x38] sm:$0xff] %v934_v41 }
 0x2bb   : > { %1441 = shalt.err (!%p1438_p9)
}
 0x2bc   : > { %s1442_s25 = scalar_lea.hbm %s1709_s30, 1024  ;;  %s1446_s8 = scalar_lea.hbm %s1757_s3, 2048 }
 0x2bd   : > { %p1443_p13 = scmp.ne.s32.totalorder %s1709_s30, %s1442_s25  ;;  %p1447_p4 = scmp.lt.s32.totalorder %s1709_s30, %s1757_s3 }
 0x2be   : > { %p1448_p8 = scmp.lt.s32.totalorder %s1446_s8, %s1442_s25 }
 0x2bf   : > { %p1444_p5 = pnand %p1443_p13, %p1773_p10 }
 0x2c0   : > { %p1449_p7 = por %p1448_p8, %p1447_p4 }
 0x2c1   : > { %p1445_p0 = pneg %p1444_p5 }
 0x2c3   : > { %p1450_p11 = pnand %p1449_p7, %p1445_p0 }
 0x2c5   : > { %1453 = shalt.err (!%p1450_p11)
}
 0x2c6   : > { %s1507_s18 = smov 512   ;;  %s1508_s20 = smov 32  }
 0x2c7   : > { %1196 = dma.vmem_to_hbm [thread:$0]  (%p1773_p10), %s1711_s6, 1024, %s1709_s30, %s944_s16, %s1507_s18, %s1507_s18, %s1508_s20  }
 0x2c8 PF: > { %s973_s5 = sand.u32 1, %s1484_s12   ;;  %p1774_p1 = scmp.ne.s32.totalorder %s1763_s19, 0 }
 0x2c9   : > { %p1775_p2 = scmp.ge.s32.totalorder %s1496_s15, 2  ;;  %s974_s27 = scalar_lea.sflag [#allocation4], %s973_s5 }
 0x2cb   : > { %p1210_p6 = pnand %p1775_p2, %p1774_p1 }
 0x2cd   : > { %p1211_p12 = pneg %p1210_p6 }
 0x2cf   : > { %1479 = dma.done.wait (%p1211_p12), %s974_s27, 1024  }
 0x2d0   : > { %1481 = vsyncadd (%p1211_p12), %s974_s27, 4294966272  ;;  %p17_p3 = scmp.ge.s32.totalorder %s1604_s9, 4   ;;  %s1776_s12 = smov %s1488_s13 }
 0x2d1   : > { %s1777_s13 = smov %s1492_s14  ;;  %s1778_s14 = smov %s1613_s17 }
 0x2d2   : > { %s1779_s15 = smov %s1604_s9  ;;  %19 = sbr.rel (!%p17_p3) target bundleno = 6 (0x6), region = 85 }
 0x2d7   :  { %979 = vsyncpa [#allocation3], 1 }
 0x2d8   :  { %981 = vsyncpa [#allocation3 + $0x1], 1 }
 0x2d9   :  { %982 = vsyncpa [#allocation6], 1 }
 0x2da   :  { %983 = vsyncpa [#allocation4], 1 }
 0x2db   :  { %985 = vsyncpa [#allocation4 + $0x1], 1 }

</bundles_post_ra>
